<compile_context>
chip_gen: v6e
topology: v6e:2x2x1
jax: 0.10.0
libtpu: 0.0.40
codegen_flags: <defaults>
</compile_context>

<pallas_src>
import math

import jax
import jax.numpy as jnp
from jax.experimental import pallas as pl
from jax.experimental.pallas import tpu as pltpu


def _add_pe_kernel(x_ref, pe_ref, o_ref):
    # x_ref/o_ref: (TS, B*D) row tile; pe_ref: (1, B*D) broadcast over rows.
    o_ref[...] = x_ref[...] + pe_ref[...]


def _make_add_pe_dropout_kernel(dropout_p: float):
    """Fused (x + pe) -> dropout(p) kernel using a precomputed uint32 bit stream."""
    keep_scale = 1.0 / (1.0 - dropout_p)
    # P(bits < threshold) == dropout_p for uniform uint32 bits.
    threshold_int = min(int(dropout_p * (2.0 ** 32)), 2 ** 32 - 1)

    def kernel(x_ref, pe_ref, bits_ref, o_ref):
        keep = bits_ref[...] >= jnp.uint32(threshold_int)
        y = x_ref[...] + pe_ref[...]
        o_ref[...] = jnp.where(keep, y * jnp.asarray(keep_scale, y.dtype),
                               jnp.zeros_like(y))

    return kernel


def positional_encoding_forward(x, pe, *, dropout_p=0.1, training=False, seed=0):
    """x: (S, B, D), pe: (1, max_len, D) -> (S, B, D).

    Matches torch: out = dropout(x + pe[:, :x.size(1)]).
    """
    S, B, D = x.shape
    if B > pe.shape[1]:
        raise ValueError(
            "batch (x.shape[1]) must be <= max_len (pe.shape[1]); the torch "
            "module indexes pe by the batch axis.")
    if not (0.0 <= dropout_p < 1.0):
        raise ValueError("dropout_p must be in [0, 1).")

    # torch: pe[:, :x.size(1)]  -> (1, B, D), broadcast over seq_len.
    pe_slice = pe[:, :B, :].astype(x.dtype)

    # Lane-dense 2-D layout: last dim B*D maps to lanes, rows map to sublanes.
    BD = B * D
    x2 = x.reshape(S, BD)
    pe2 = pe_slice.reshape(1, BD)

    # Row-tile sizing: ~8 MiB input tiles amortize per-step overhead while
    # keeping double-buffered in/out (+ optional bits) tiles well under v7x's
    # 64 MiB VMEM.
    itemsize = x.dtype.itemsize
    row_bytes = BD * itemsize
    target_block_bytes = 8 * 1024 * 1024
    ts = max(1, target_block_bytes // max(row_bytes, 1))
    if ts >= S:
        ts = S                              # one tile covers all rows
    else:
        ts = max(8, (ts // 8) * 8)          # sublane-aligned row tile
    grid = (pl.cdiv(S, ts),)

    block_bytes = ts * row_bytes
    bits_block_bytes = ts * BD * 4
    # Double-buffered input + output (+ bits) tiles + PE + slack.
    vmem_needed = 4 * block_bytes + 2 * bits_block_bytes + 4 * row_bytes + (2 << 20)
    vmem_limit = int(min(max(vmem_needed, 16 << 20), 48 << 20))

    x_spec = pl.BlockSpec((ts, BD), lambda s: (s, 0))
    pe_spec = pl.BlockSpec((1, BD), lambda s: (0, 0))   # constant -> DMA'd once
    out_spec = pl.BlockSpec((ts, BD), lambda s: (s, 0))

    compiler_params = pltpu.CompilerParams(
        dimension_semantics=("parallel",),
        vmem_limit_bytes=vmem_limit,
    )

    if training and dropout_p > 0.0:
        kernel = _make_add_pe_dropout_kernel(dropout_p)
        bits = jax.random.bits(jax.random.PRNGKey(seed), (S, BD), dtype=jnp.uint32)
        bits_spec = pl.BlockSpec((ts, BD), lambda s: (s, 0))
        out2 = pl.pallas_call(
            kernel,
            out_shape=jax.ShapeDtypeStruct((S, BD), x.dtype),
            grid_spec=pltpu.PrefetchScalarGridSpec(
                num_scalar_prefetch=0,
                grid=grid,
                in_specs=[x_spec, pe_spec, bits_spec],
                out_specs=out_spec,
            ),
            compiler_params=compiler_params,
        )(x2, pe2, bits)
    else:
        out2 = pl.pallas_call(
            _add_pe_kernel,
            out_shape=jax.ShapeDtypeStruct((S, BD), x.dtype),
            grid_spec=pltpu.PrefetchScalarGridSpec(
                num_scalar_prefetch=0,
                grid=grid,
                in_specs=[x_spec, pe_spec],
                out_specs=out_spec,
            ),
            compiler_params=compiler_params,
        )(x2, pe2)

    return out2.reshape(S, B, D)


def make_pe_table(d_model: int, max_len: int) -> jnp.ndarray:
    """Deterministic sinusoidal table, same construction as the torch module."""
    if d_model % 2 != 0:
        # Same implicit constraint as the torch original (shape mismatch there).
        raise ValueError("d_model must be even.")
    position = jnp.arange(max_len, dtype=jnp.float32)[:, None]            # (max_len, 1)
    div_term = jnp.exp(
        jnp.arange(0, d_model, 2, dtype=jnp.float32)
        * (-math.log(10000.0) / d_model)
    )                                                                     # (d_model/2,)
    pe = jnp.zeros((1, max_len, d_model), dtype=jnp.float32)
    pe = pe.at[0, :, 0::2].set(jnp.sin(position * div_term))
    pe = pe.at[0, :, 1::2].set(jnp.cos(position * div_term))
    return pe


if __name__ == "__main__":
    # Small shapes consistent with the forward: x is [seq_len, batch, d_model].
    # batch*d_model = 128 makes the flattened slab exactly lane-dense.
    seq_len, batch, d_model, max_len = 16, 4, 32, 64

    key = jax.random.PRNGKey(0)
    x = jax.random.normal(key, (seq_len, batch, d_model), dtype=jnp.float32)
    pe = make_pe_table(d_model, max_len)

    # Plain-JAX reference (same broadcasting quirk as the torch code).
    ref = x + pe[:, :batch]

    # Eval mode: dropout is identity -> exact match with reference.
    out = positional_encoding_forward(x, pe, training=False)
    out = jax.block_until_ready(out)
    assert out.shape == (seq_len, batch, d_model)
    assert jnp.allclose(out, ref, atol=1e-6), "eval-mode mismatch vs reference"

    # Training mode: fused dropout. Every element must be either 0 (dropped)
    # or ref/(1-p) (kept and rescaled).
    p = 0.1
    out_tr = positional_encoding_forward(x, pe, dropout_p=p, training=True, seed=1234)
    out_tr = jax.block_until_ready(out_tr)
    assert out_tr.shape == (seq_len, batch, d_model)
    scaled = ref / (1.0 - p)
    ok = jnp.isclose(out_tr, 0.0, atol=1e-6) | jnp.isclose(
        out_tr, scaled, atol=1e-5, rtol=1e-5)
    assert bool(jnp.all(ok)), "training-mode output not in {0, ref/(1-p)}"

    print("KERNEL_OK")
</pallas_src>

<mosaic_0001>
module attributes {stable_mosaic.version = 11 : i64} {
  func.func @_add_pe_kernel(%arg0: i32, %arg1: memref<16x128xf32, #tpu.memory_space<vmem>>, %arg2: memref<1x128xf32, #tpu.memory_space<vmem>>, %arg3: memref<16x128xf32, #tpu.memory_space<vmem>>) attributes {dimension_semantics = [#tpu.dimension_semantics<parallel>], iteration_bounds = array<i64: 1>, scalar_prefetch = 0 : i64, scratch_operands = 0 : i64, tpu.core_type = #tpu.core_type<tc>, window_params = [{transform_indices = @transform_0, window_bounds = array<i64: 16, 128>}, {pipeline_mode = #tpu.pipeline_mode<synchronous>, transform_indices = @transform_1, window_bounds = array<i64: 1, 128>}, {transform_indices = @transform_2, window_bounds = array<i64: 16, 128>}]} {
    %c0 = arith.constant 0 : index
    %c0_0 = arith.constant 0 : index
    %0 = vector.load %arg1[%c0, %c0_0] : memref<16x128xf32, #tpu.memory_space<vmem>>, vector<16x128xf32>
    %c0_1 = arith.constant 0 : index
    %c0_2 = arith.constant 0 : index
    %1 = vector.load %arg2[%c0_1, %c0_2] : memref<1x128xf32, #tpu.memory_space<vmem>>, vector<1x128xf32>
    %2 = vector.broadcast %1 : vector<1x128xf32> to vector<16x128xf32>
    %3 = arith.addf %0, %2 : vector<16x128xf32>
    %c0_3 = arith.constant 0 : index
    %c0_4 = arith.constant 0 : index
    %4 = vector.load %arg3[%c0_3, %c0_4] : memref<16x128xf32, #tpu.memory_space<vmem>>, vector<16x128xf32>
    tpu.vector_store %arg3[%c0_3, %c0_4], %3 {strides = array<i32>} : memref<16x128xf32, #tpu.memory_space<vmem>>, vector<16x128xf32>,
    return
  }
  func.func @transform_0(%arg0: i32) -> (i32, i32) {
    %c0_i32 = arith.constant 0 : i32
    %c0_i32_0 = arith.constant 0 : i32
    return %arg0, %c0_i32 : i32, i32
  }
  func.func @transform_1(%arg0: i32) -> (i32, i32) {
    %c0_i32 = arith.constant 0 : i32
    %c0_i32_0 = arith.constant 0 : i32
    %c0_i32_1 = arith.constant 0 : i32
    return %c0_i32, %c0_i32_0 : i32, i32
  }
  func.func @transform_2(%arg0: i32) -> (i32, i32) {
    %c0_i32 = arith.constant 0 : i32
    %c0_i32_0 = arith.constant 0 : i32
    return %arg0, %c0_i32 : i32, i32
  }
}

</mosaic_0001>

<bundles_post_ra>
// kernel: tpu_custom_call.1
= control target key start
LH: loop header
LB: loop body
LE: loop exit
PB: predicated region body
PF: predicated region fallthrough
CT: control target
= control target key end

     0   :  { %7 = vsyncpa [#allocation3], 0  ;;  %s133_s0 = inlined_call_operand.hbm [shape: f32[16,128], index: 0, kind: input, shape index: {}]   ;;  %s134_s1 = inlined_call_operand.vmem [shape: f32[1,128], index: 1, kind: input, shape index: {}]   ;;  %s135_s2 = inlined_call_operand.hbm [shape: f32[16,128], index: 2, kind: output, shape index: {}]  }
   0x1   :  { %8 = vsyncpa [#allocation4], 0  ;;  %s105_s9 = smov [#allocation2]  }
   0x2   :  { %s14_s10 = sshll.u32 %s105_s9, 4  ;;  %s15_s10 = int_to_ptr.vmem [resolvable:$true] %s14_s10 }
   0x3   :  { %s69_s11 = scalar_lea.vmem %s15_s10, 256  ;;  %p74_p1 = scmp.lt.s32.totalorder %s15_s10, %s15_s10 }
   0x4   :  { %p70_p0 = scmp.ne.s32.totalorder %s15_s10, %s69_s11  ;;  %p75_p2 = scmp.lt.s32.totalorder %s69_s11, %s69_s11 }
   0x6   :  { %p76_p3 = por %p75_p2, %p74_p1 }
   0x8   :  { %p77_p4 = pnand %p76_p3, %p70_p0 }
   0xa   :  { %80 = shalt.err (!%p77_p4)
}
   0xb   :  { %s106_s12 = smov 128   ;;  %s107_s13 = smov 8  }
   0xc   :  { %20 = dma.hbm_to_vmem [thread:$0]  %s133_s0, 256, %s15_s10, [#allocation3], %s106_s12, %s106_s12, %s107_s13  }
   0xd   :  { %101 = dma.done.wait [#allocation3], 256  }
   0xe   :  { %102 = vsyncadd [#allocation3], 4294967040  ;;  %s108_s16 = smov [#allocation5]   ;;  %v26_v0 = vld [vmem:[#allocation2] sm:$0xff]  ;;  %v27_v2 = vld [vmem:[#allocation2 + $0x8] sm:$0xff] }
   0xf   :  { %s44_s17 = sshll.u32 %s108_s16, 4  ;;  %v56_v1 = vld [vmem:[%s134_s1] ss:$0 sm:$0xff]  ;;  %s45_s17 = int_to_ptr.vmem [resolvable:$true] %s44_s17 }
  0x10   :  { %v35_v3 = vadd.f32 %v56_v1, %v26_v0  ;;  %v36_v4 = vadd.f32 %v56_v1, %v27_v2  ;;  %s81_s20 = scalar_lea.vmem %s45_s17, 256  ;;  %p86_p6 = scmp.lt.s32.totalorder %s45_s17, %s45_s17 }
  0x11   :  { %p82_p5 = scmp.ne.s32.totalorder %s45_s17, %s81_s20  ;;  %p87_p7 = scmp.lt.s32.totalorder %s81_s20, %s81_s20 }
  0x12   :  { %37 = vst [vmem:[#allocation5] sm:$0xff] %v35_v3  ;;  %38 = vst [vmem:[#allocation5 + $0x8] sm:$0xff] %v36_v4 }
  0x13   :  { %p88_p8 = por %p87_p7, %p86_p6 }
  0x15   :  { %p89_p9 = pnand %p88_p8, %p82_p5 }
  0x17   :  { %92 = shalt.err (!%p89_p9)
}
  0x18   :  { %50 = dma.vmem_to_hbm [thread:$0]  %s45_s17, 256, %s135_s2, [#allocation4], %s106_s12, %s106_s12, %s107_s13  }
  0x19   :  { %103 = dma.done.wait [#allocation4], 256  }
  0x1a   :  { %104 = vsyncadd [#allocation4], 4294967040 }
  0x1b   :  { %54 = vsyncpa [#allocation3], 1 }
  0x1c   :  { %55 = vsyncpa [#allocation4], 1 }

</bundles_post_ra>
